<compile_context>
chip_gen: v6e
topology: v6e:2x2x1
jax: 0.10.0
libtpu: 0.0.40
codegen_flags: <defaults>
</compile_context>

<pallas_src>
import jax
import jax.numpy as jnp
from jax.experimental import pallas as pl
from jax.experimental.pallas import tpu as pltpu

_LANES = 128
_MAX_OUTSTANDING_DMAS = 8  # a few concurrent copies saturate HBM read+write


def _chunk_rows(rows: int):
    """Split `rows` into <= _MAX_OUTSTANDING_DMAS contiguous static chunks."""
    n_chunks = max(1, min(rows, _MAX_OUTSTANDING_DMAS))
    base, rem = divmod(rows, n_chunks)
    sizes = tuple(base + (1 if c < rem else 0) for c in range(n_chunks))
    starts, s = [], 0
    for sz in sizes:
        starts.append(s)
        s += sz
    return tuple(starts), sizes


def _make_memcpy_kernel(starts, sizes):
    """HBM->HBM memcpy: start all chunk DMAs, then wait on all of them."""
    n_chunks = len(sizes)

    def kernel(x_hbm, o_hbm, sems):
        copies = []
        for c in range(n_chunks):  # static Python loop, unrolled at trace time
            sl = pl.ds(starts[c], sizes[c])
            cp = pltpu.make_async_copy(x_hbm.at[sl, :], o_hbm.at[sl, :], sems.at[c])
            cp.start()
            copies.append(cp)
        for cp in copies:
            cp.wait()

    return kernel


def _pallas_copy(x: jax.Array) -> jax.Array:
    """Materialized identity as a chunked HBM->HBM DMA (no VMEM round-trip)."""
    n = x.size
    if n == 0:
        return jnp.zeros(x.shape, x.dtype)

    itemsize = jnp.dtype(x.dtype).itemsize
    cost = pl.CostEstimate(flops=0, transcendentals=0,
                           bytes_accessed=2 * n * itemsize)

    if n % _LANES == 0:
        # Contiguous reshape is free; gives a row axis to chunk the DMAs over.
        view = x.reshape(n // _LANES, _LANES)
    else:
        # Odd total size: one contiguous row, one HBM->HBM DMA. No VMEM is
        # involved, so arbitrarily large odd shapes cannot hit a VMEM limit.
        view = x.reshape(1, n)

    starts, sizes = _chunk_rows(view.shape[0])
    out = pl.pallas_call(
        _make_memcpy_kernel(starts, sizes),
        out_shape=jax.ShapeDtypeStruct(view.shape, view.dtype),
        in_specs=[pl.BlockSpec(memory_space=pl.ANY)],   # input stays in HBM
        out_specs=pl.BlockSpec(memory_space=pl.ANY),    # output stays in HBM
        scratch_shapes=[pltpu.SemaphoreType.DMA((len(sizes),))],
        cost_estimate=cost,
    )(view)
    return out.reshape(x.shape)


def identity_positional_encoding(x: jax.Array, *, materialize: bool = False) -> jax.Array:
    """Pallas implementation of IdentityPositionalEncoding.forward.

    Default (materialize=False): returns `x` directly -- the production path.
    A pure identity should launch no kernel and move no bytes; never put the
    copy on the hot path.
    materialize=True: verification path; returns a fresh buffer produced by a
    chunked HBM->HBM DMA memcpy kernel.
    """
    if not materialize:
        return x
    return _pallas_copy(x)


if __name__ == "__main__":
    key = jax.random.PRNGKey(0)
    batch, seq, in_dim = 2, 8, 32  # module contract: in_dim == out_dim
    x = jax.random.normal(key, (batch, seq, in_dim), dtype=jnp.float32)

    # Hot path: zero-cost identity (no kernel launched, no HBM traffic).
    y_fast = identity_positional_encoding(x)
    assert y_fast is x

    # Pallas path: chunked HBM->HBM DMA memcpy, run once on TPU.
    y = identity_positional_encoding(x, materialize=True)
    jax.block_until_ready(y)

    assert y.shape == x.shape and y.dtype == x.dtype
    assert bool(jnp.array_equal(y, x))
    print("KERNEL_OK")
</pallas_src>

<mosaic_0001>
module attributes {stable_mosaic.version = 11 : i64} {
  func.func @kernel(%arg0: memref<4x128xf32, #tpu.memory_space<any>>, %arg1: memref<4x128xf32, #tpu.memory_space<any>>, %arg2: memref<4x!tpu.dma_semaphore, #tpu.memory_space<semaphore_mem>>) attributes {dimension_semantics = [], scalar_prefetch = 0 : i64, scratch_operands = 1 : i64, tpu.core_type = #tpu.core_type<tc>} {
    %c0_i32 = arith.constant 0 : i32
    %c0_i32_0 = arith.constant 0 : i32
    %c0_i32_1 = arith.constant 0 : i32
    %0 = tpu.memref_slice %arg0[%c0_i32_0, %c0_i32_1] : memref<4x128xf32, #tpu.memory_space<any>> -> memref<1x128xf32, #tpu.memory_space<any>>
    %c0_i32_2 = arith.constant 0 : i32
    %c0_i32_3 = arith.constant 0 : i32
    %1 = tpu.memref_slice %arg1[%c0_i32_2, %c0_i32_3] : memref<4x128xf32, #tpu.memory_space<any>> -> memref<1x128xf32, #tpu.memory_space<any>>
    %2 = tpu.memref_slice %arg2[%c0_i32] : memref<4x!tpu.dma_semaphore, #tpu.memory_space<semaphore_mem>> -> memref<1x!tpu.dma_semaphore, #tpu.memory_space<semaphore_mem>>
    %3 = tpu.memref_squeeze %2 : memref<1x!tpu.dma_semaphore, #tpu.memory_space<semaphore_mem>> -> memref<!tpu.dma_semaphore, #tpu.memory_space<semaphore_mem>>
    tpu.enqueue_dma source(%0 : memref<1x128xf32, #tpu.memory_space<any>>) target(%1 : memref<1x128xf32, #tpu.memory_space<any>>) target_semaphore(%3 : memref<!tpu.dma_semaphore, #tpu.memory_space<semaphore_mem>>)
    %c1_i32 = arith.constant 1 : i32
    %c1_i32_4 = arith.constant 1 : i32
    %c0_i32_5 = arith.constant 0 : i32
    %4 = tpu.memref_slice %arg0[%c1_i32_4, %c0_i32_5] : memref<4x128xf32, #tpu.memory_space<any>> -> memref<1x128xf32, #tpu.memory_space<any>>
    %c1_i32_6 = arith.constant 1 : i32
    %c0_i32_7 = arith.constant 0 : i32
    %5 = tpu.memref_slice %arg1[%c1_i32_6, %c0_i32_7] : memref<4x128xf32, #tpu.memory_space<any>> -> memref<1x128xf32, #tpu.memory_space<any>>
    %6 = tpu.memref_slice %arg2[%c1_i32] : memref<4x!tpu.dma_semaphore, #tpu.memory_space<semaphore_mem>> -> memref<1x!tpu.dma_semaphore, #tpu.memory_space<semaphore_mem>>
    %7 = tpu.memref_squeeze %6 : memref<1x!tpu.dma_semaphore, #tpu.memory_space<semaphore_mem>> -> memref<!tpu.dma_semaphore, #tpu.memory_space<semaphore_mem>>
    tpu.enqueue_dma source(%4 : memref<1x128xf32, #tpu.memory_space<any>>) target(%5 : memref<1x128xf32, #tpu.memory_space<any>>) target_semaphore(%7 : memref<!tpu.dma_semaphore, #tpu.memory_space<semaphore_mem>>)
    %c2_i32 = arith.constant 2 : i32
    %c2_i32_8 = arith.constant 2 : i32
    %c0_i32_9 = arith.constant 0 : i32
    %8 = tpu.memref_slice %arg0[%c2_i32_8, %c0_i32_9] : memref<4x128xf32, #tpu.memory_space<any>> -> memref<1x128xf32, #tpu.memory_space<any>>
    %c2_i32_10 = arith.constant 2 : i32
    %c0_i32_11 = arith.constant 0 : i32
    %9 = tpu.memref_slice %arg1[%c2_i32_10, %c0_i32_11] : memref<4x128xf32, #tpu.memory_space<any>> -> memref<1x128xf32, #tpu.memory_space<any>>
    %10 = tpu.memref_slice %arg2[%c2_i32] : memref<4x!tpu.dma_semaphore, #tpu.memory_space<semaphore_mem>> -> memref<1x!tpu.dma_semaphore, #tpu.memory_space<semaphore_mem>>
    %11 = tpu.memref_squeeze %10 : memref<1x!tpu.dma_semaphore, #tpu.memory_space<semaphore_mem>> -> memref<!tpu.dma_semaphore, #tpu.memory_space<semaphore_mem>>
    tpu.enqueue_dma source(%8 : memref<1x128xf32, #tpu.memory_space<any>>) target(%9 : memref<1x128xf32, #tpu.memory_space<any>>) target_semaphore(%11 : memref<!tpu.dma_semaphore, #tpu.memory_space<semaphore_mem>>)
    %c3_i32 = arith.constant 3 : i32
    %c3_i32_12 = arith.constant 3 : i32
    %c0_i32_13 = arith.constant 0 : i32
    %12 = tpu.memref_slice %arg0[%c3_i32_12, %c0_i32_13] : memref<4x128xf32, #tpu.memory_space<any>> -> memref<1x128xf32, #tpu.memory_space<any>>
    %c3_i32_14 = arith.constant 3 : i32
    %c0_i32_15 = arith.constant 0 : i32
    %13 = tpu.memref_slice %arg1[%c3_i32_14, %c0_i32_15] : memref<4x128xf32, #tpu.memory_space<any>> -> memref<1x128xf32, #tpu.memory_space<any>>
    %14 = tpu.memref_slice %arg2[%c3_i32] : memref<4x!tpu.dma_semaphore, #tpu.memory_space<semaphore_mem>> -> memref<1x!tpu.dma_semaphore, #tpu.memory_space<semaphore_mem>>
    %15 = tpu.memref_squeeze %14 : memref<1x!tpu.dma_semaphore, #tpu.memory_space<semaphore_mem>> -> memref<!tpu.dma_semaphore, #tpu.memory_space<semaphore_mem>>
    tpu.enqueue_dma source(%12 : memref<1x128xf32, #tpu.memory_space<any>>) target(%13 : memref<1x128xf32, #tpu.memory_space<any>>) target_semaphore(%15 : memref<!tpu.dma_semaphore, #tpu.memory_space<semaphore_mem>>)
    %c0_i32_16 = arith.constant 0 : i32
    %c0_i32_17 = arith.constant 0 : i32
    %c0_i32_18 = arith.constant 0 : i32
    %16 = tpu.memref_slice %arg0[%c0_i32_17, %c0_i32_18] : memref<4x128xf32, #tpu.memory_space<any>> -> memref<1x128xf32, #tpu.memory_space<any>>
    %c0_i32_19 = arith.constant 0 : i32
    %c0_i32_20 = arith.constant 0 : i32
    %17 = tpu.memref_slice %arg1[%c0_i32_19, %c0_i32_20] : memref<4x128xf32, #tpu.memory_space<any>> -> memref<1x128xf32, #tpu.memory_space<any>>
    %18 = tpu.memref_slice %arg2[%c0_i32_16] : memref<4x!tpu.dma_semaphore, #tpu.memory_space<semaphore_mem>> -> memref<1x!tpu.dma_semaphore, #tpu.memory_space<semaphore_mem>>
    %19 = tpu.memref_squeeze %18 : memref<1x!tpu.dma_semaphore, #tpu.memory_space<semaphore_mem>> -> memref<!tpu.dma_semaphore, #tpu.memory_space<semaphore_mem>>
    tpu.wait_dma2 semaphore(%19 : memref<!tpu.dma_semaphore, #tpu.memory_space<semaphore_mem>>) src(%16 : memref<1x128xf32, #tpu.memory_space<any>>) dst(%17 : memref<1x128xf32, #tpu.memory_space<any>>)
    %c1_i32_21 = arith.constant 1 : i32
    %c1_i32_22 = arith.constant 1 : i32
    %c0_i32_23 = arith.constant 0 : i32
    %20 = tpu.memref_slice %arg0[%c1_i32_22, %c0_i32_23] : memref<4x128xf32, #tpu.memory_space<any>> -> memref<1x128xf32, #tpu.memory_space<any>>
    %c1_i32_24 = arith.constant 1 : i32
    %c0_i32_25 = arith.constant 0 : i32
    %21 = tpu.memref_slice %arg1[%c1_i32_24, %c0_i32_25] : memref<4x128xf32, #tpu.memory_space<any>> -> memref<1x128xf32, #tpu.memory_space<any>>
    %22 = tpu.memref_slice %arg2[%c1_i32_21] : memref<4x!tpu.dma_semaphore, #tpu.memory_space<semaphore_mem>> -> memref<1x!tpu.dma_semaphore, #tpu.memory_space<semaphore_mem>>
    %23 = tpu.memref_squeeze %22 : memref<1x!tpu.dma_semaphore, #tpu.memory_space<semaphore_mem>> -> memref<!tpu.dma_semaphore, #tpu.memory_space<semaphore_mem>>
    tpu.wait_dma2 semaphore(%23 : memref<!tpu.dma_semaphore, #tpu.memory_space<semaphore_mem>>) src(%20 : memref<1x128xf32, #tpu.memory_space<any>>) dst(%21 : memref<1x128xf32, #tpu.memory_space<any>>)
    %c2_i32_26 = arith.constant 2 : i32
    %c2_i32_27 = arith.constant 2 : i32
    %c0_i32_28 = arith.constant 0 : i32
    %24 = tpu.memref_slice %arg0[%c2_i32_27, %c0_i32_28] : memref<4x128xf32, #tpu.memory_space<any>> -> memref<1x128xf32, #tpu.memory_space<any>>
    %c2_i32_29 = arith.constant 2 : i32
    %c0_i32_30 = arith.constant 0 : i32
    %25 = tpu.memref_slice %arg1[%c2_i32_29, %c0_i32_30] : memref<4x128xf32, #tpu.memory_space<any>> -> memref<1x128xf32, #tpu.memory_space<any>>
    %26 = tpu.memref_slice %arg2[%c2_i32_26] : memref<4x!tpu.dma_semaphore, #tpu.memory_space<semaphore_mem>> -> memref<1x!tpu.dma_semaphore, #tpu.memory_space<semaphore_mem>>
    %27 = tpu.memref_squeeze %26 : memref<1x!tpu.dma_semaphore, #tpu.memory_space<semaphore_mem>> -> memref<!tpu.dma_semaphore, #tpu.memory_space<semaphore_mem>>
    tpu.wait_dma2 semaphore(%27 : memref<!tpu.dma_semaphore, #tpu.memory_space<semaphore_mem>>) src(%24 : memref<1x128xf32, #tpu.memory_space<any>>) dst(%25 : memref<1x128xf32, #tpu.memory_space<any>>)
    %c3_i32_31 = arith.constant 3 : i32
    %c3_i32_32 = arith.constant 3 : i32
    %c0_i32_33 = arith.constant 0 : i32
    %28 = tpu.memref_slice %arg0[%c3_i32_32, %c0_i32_33] : memref<4x128xf32, #tpu.memory_space<any>> -> memref<1x128xf32, #tpu.memory_space<any>>
    %c3_i32_34 = arith.constant 3 : i32
    %c0_i32_35 = arith.constant 0 : i32
    %29 = tpu.memref_slice %arg1[%c3_i32_34, %c0_i32_35] : memref<4x128xf32, #tpu.memory_space<any>> -> memref<1x128xf32, #tpu.memory_space<any>>
    %30 = tpu.memref_slice %arg2[%c3_i32_31] : memref<4x!tpu.dma_semaphore, #tpu.memory_space<semaphore_mem>> -> memref<1x!tpu.dma_semaphore, #tpu.memory_space<semaphore_mem>>
    %31 = tpu.memref_squeeze %30 : memref<1x!tpu.dma_semaphore, #tpu.memory_space<semaphore_mem>> -> memref<!tpu.dma_semaphore, #tpu.memory_space<semaphore_mem>>
    tpu.wait_dma2 semaphore(%31 : memref<!tpu.dma_semaphore, #tpu.memory_space<semaphore_mem>>) src(%28 : memref<1x128xf32, #tpu.memory_space<any>>) dst(%29 : memref<1x128xf32, #tpu.memory_space<any>>)
    return
  }
}

</mosaic_0001>

<bundles_post_ra>
// kernel: tpu_custom_call.1
= control target key start
LH: loop header
LB: loop body
LE: loop exit
PB: predicated region body
PF: predicated region fallthrough
CT: control target
= control target key end

     0   :  { %s97_s9 = smov [#allocation2]   ;;  %s98_s10 = smov 131072   ;;  %s137_s0 = inlined_call_operand.hbm [shape: f32[4,128], index: 0, kind: input, shape index: {}]   ;;  %s138_s1 = inlined_call_operand.hbm [shape: f32[4,128], index: 1, kind: output, shape index: {}]  }
   0x1   :  { %s13_s8 = scalar_lea.hbm %s137_s0, 16  ;;  %s99_s11 = smov 0  }
   0x2   :  { %12 = dma.general %s137_s0, 16, %s138_s1, %s97_s9, %s98_s10, [#allocation4], %s99_s11, 0  }
   0x3   :  { %s14_s18 = scalar_lea.hbm %s138_s1, 16  ;;  %s100_s19 = smov [#allocation2 + $0x1]  }
   0x4   :  { %22 = dma.general %s13_s8, 16, %s14_s18, %s100_s19, %s98_s10, [#allocation6], %s99_s11, 0  }
   0x5   :  { %s23_s22 = scalar_lea.hbm %s137_s0, 32  ;;  %s24_s25 = scalar_lea.hbm %s138_s1, 32 }
   0x6   :  { %s33_s28 = scalar_lea.hbm %s137_s0, 48  ;;  %s101_s29 = smov [#allocation2 + $0x2]  }
   0x7   :  { %32 = dma.general %s23_s22, 16, %s24_s25, %s101_s29, %s98_s10, [#allocation8], %s99_s11, 0  }
   0x8   :  { %s34_s3 = scalar_lea.hbm %s138_s1, 48  ;;  %s102_s4 = smov [#allocation2 + $0x3]  }
   0x9   :  { %42 = dma.general %s33_s28, 16, %s34_s3, %s102_s4, %s98_s10, [#allocation10], %s99_s11, 0  }
   0xa   :  { %89 = dma.done.wait [#allocation2], 16 }
   0xb   :  { %90 = vsyncadd [#allocation2], 4294967280 }
   0xc   :  { %91 = dma.done.wait [#allocation2 + $0x1], 16 }
   0xd   :  { %92 = vsyncadd [#allocation2 + $0x1], 4294967280 }
   0xe   :  { %93 = dma.done.wait [#allocation2 + $0x2], 16 }
   0xf   :  { %94 = vsyncadd [#allocation2 + $0x2], 4294967280 }
  0x10   :  { %95 = dma.done.wait [#allocation2 + $0x3], 16 }
  0x11   :  { %96 = vsyncadd [#allocation2 + $0x3], 4294967280 }
  0x12   :  { %52 = vsyncmov [#allocation2] }
  0x15   :  { %s53_s5 = vpop.sfrf %52 }
  0x16   :  { %p79_p0 = scmp.ne.s32.totalorder %s53_s5, 0 }
  0x18   :  { %57 = shalt.err (%p79_p0)  }
  0x19   :  { %59 = vsyncmov [#allocation2 + $0x1] }
  0x1c   :  { %s60_s0 = vpop.sfrf %59 }
  0x1d   :  { %p80_p1 = scmp.ne.s32.totalorder %s60_s0, 0 }
  0x1f   :  { %64 = shalt.err (%p80_p1)  }
  0x20   :  { %66 = vsyncmov [#allocation2 + $0x2] }
  0x23   :  { %s67_s1 = vpop.sfrf %66 }
  0x24   :  { %p81_p2 = scmp.ne.s32.totalorder %s67_s1, 0 }
  0x26   :  { %71 = shalt.err (%p81_p2)  }
  0x27   :  { %73 = vsyncmov [#allocation2 + $0x3] }
  0x2a   :  { %s74_s6 = vpop.sfrf %73 }
  0x2b   :  { %p82_p3 = scmp.ne.s32.totalorder %s74_s6, 0 }
  0x2d   :  { %78 = shalt.err (%p82_p3)  }

</bundles_post_ra>
